<compile_context>
chip_gen: v6e
topology: v6e:2x2x1
jax: 0.10.0
libtpu: 0.0.40
codegen_flags: <defaults>
</compile_context>

<pallas_src>
import functools
import math

import jax
import jax.numpy as jnp
from jax.experimental import pallas as pl
from jax.experimental.pallas import tpu as pltpu


def _round_up(x, m):
    return ((x + m - 1) // m) * m


def _cdiv(a, b):
    return -(-a // b)


def _row_tiling(n, max_rows):
    """Pick (tile, num_tiles) that minimizes padding; tile is a multiple of 16
    (safe sublane count for bf16 blocks)."""
    num_tiles = max(1, _cdiv(n, max_rows))
    tile = _round_up(_cdiv(n, num_tiles), 16)
    return tile, num_tiles


# ---------------------------------------------------------------------------
# Pallas kernels
# ---------------------------------------------------------------------------
def _linear_kernel(x_ref, w_ref, b_ref, o_ref, *, activation):
    # bf16 MXU operands, f32 accumulation; the cast is in-vreg (no-op for bf16 in).
    x = x_ref[...].astype(jnp.bfloat16)
    y = jnp.dot(x, w_ref[...], preferred_element_type=jnp.float32) + b_ref[...]
    if activation == "relu":
        y = jnp.maximum(y, 0.0)
    o_ref[...] = y.astype(o_ref.dtype)


def linear_pallas(x, w, b, activation=None, out_dtype=jnp.bfloat16, max_rows=256):
    """y = act(x @ w + b). Row-tiled MXU matmul; bf16 operands, f32 accumulation,
    bf16 output by default so every activation tensor is half-width in HBM."""
    n, k = x.shape
    f = w.shape[1]
    tile, num_tiles = _row_tiling(n, max_rows)
    n_pad = tile * num_tiles
    if n_pad != n:
        x = jnp.pad(x, ((0, n_pad - n), (0, 0)))
    out = pl.pallas_call(
        functools.partial(_linear_kernel, activation=activation),
        out_shape=jax.ShapeDtypeStruct((n_pad, f), out_dtype),
        grid=(num_tiles,),
        in_specs=[
            pl.BlockSpec((tile, k), lambda i: (i, 0)),
            pl.BlockSpec((k, f), lambda i: (0, 0)),
            pl.BlockSpec((1, f), lambda i: (0, 0)),
        ],
        out_specs=pl.BlockSpec((tile, f), lambda i: (i, 0)),
        compiler_params=pltpu.CompilerParams(dimension_semantics=("parallel",)),
    )(x, w, b)
    return out[:n] if n_pad != n else out


def _edge_score_kernel(q_ref, k_ref, s_ref, o_ref):
    # scores_T[h, e] = sum_d q[e, h*D+d] * k[e, h*D+d] * p_rel[h] / sqrt(D)
    # (p_rel and the 1/sqrt(D) scale are baked into the [H, hidden] selector).
    # Upcast bf16 -> f32 in-vreg before the VPU product (v5e has no bf16 VALU).
    t = q_ref[...].astype(jnp.float32) * k_ref[...].astype(jnp.float32)  # [tile, hid]
    # Lane-dense [H, tile] store (edge tile on the lane axis).
    o_ref[...] = jax.lax.dot_general(
        s_ref[...], t, (((1,), (1,)), ((), ())),
        preferred_element_type=jnp.float32)


def edge_score_pallas(q_i, k_j, head_sum_t, max_rows=1024):
    """scores_T[h, e] for one edge type; q_i / k_j are [E, hidden] (bf16 ok),
    head_sum_t is the [H, hidden] f32 selector (p_rel * scale baked in)."""
    e, hidden = q_i.shape
    h = head_sum_t.shape[0]
    if e <= max_rows:
        tile, num_tiles = _round_up(e, 16), 1
    else:
        # Multi-tile: tile must be a multiple of 128 so the [H, tile] output
        # block stays lane-dense / unmasked.  2 inputs x 2 buffers x tile x hidden
        # bf16 + output is well under the scoped VMEM limit even on v7x.
        tile, num_tiles = max_rows, _cdiv(e, max_rows)
    e_pad = tile * num_tiles
    if e_pad != e:
        q_i = jnp.pad(q_i, ((0, e_pad - e), (0, 0)))
        k_j = jnp.pad(k_j, ((0, e_pad - e), (0, 0)))
    out = pl.pallas_call(
        _edge_score_kernel,
        out_shape=jax.ShapeDtypeStruct((h, e_pad), jnp.float32),
        grid=(num_tiles,),
        in_specs=[
            pl.BlockSpec((tile, hidden), lambda i: (i, 0)),
            pl.BlockSpec((tile, hidden), lambda i: (i, 0)),
            pl.BlockSpec((h, hidden), lambda i: (0, 0)),
        ],
        out_specs=pl.BlockSpec((h, tile), lambda i: (0, i)),
        compiler_params=pltpu.CompilerParams(dimension_semantics=("parallel",)),
    )(q_i, k_j, head_sum_t)
    return out[:, :e] if e_pad != e else out


def _a_lin_skip_kernel(h_ref, xs_ref, w_ref, b_ref, beta_ref, o_ref):
    # alpha (sigmoid(skip)) is pre-folded into w/b; beta = 1 - alpha arrives as a
    # tiny (1, hidden) vector.  out = h @ (alpha*W) + alpha*b + beta * x_skip.
    y = jnp.dot(h_ref[...].astype(jnp.bfloat16), w_ref[...],
                preferred_element_type=jnp.float32)
    y = y + b_ref[...] + beta_ref[...] * xs_ref[...].astype(jnp.float32)
    o_ref[...] = y.astype(o_ref.dtype)


def a_lin_skip_pallas(h, w, b, x_skip, beta, out_dtype=jnp.bfloat16, max_rows=256):
    """HGTConv output projection + skip, row-tiled with a parallel grid so it
    survives v7x's 64 MiB VMEM (and the default scoped limit) at real node counts."""
    n, k = h.shape
    f = w.shape[1]
    tile, num_tiles = _row_tiling(n, max_rows)
    n_pad = tile * num_tiles
    if n_pad != n:
        h = jnp.pad(h, ((0, n_pad - n), (0, 0)))
        x_skip = jnp.pad(x_skip, ((0, n_pad - n), (0, 0)))
    out = pl.pallas_call(
        _a_lin_skip_kernel,
        out_shape=jax.ShapeDtypeStruct((n_pad, f), out_dtype),
        grid=(num_tiles,),
        in_specs=[
            pl.BlockSpec((tile, k), lambda i: (i, 0)),
            pl.BlockSpec((tile, f), lambda i: (i, 0)),
            pl.BlockSpec((k, f), lambda i: (0, 0)),
            pl.BlockSpec((1, f), lambda i: (0, 0)),
            pl.BlockSpec((1, f), lambda i: (0, 0)),
        ],
        out_specs=pl.BlockSpec((tile, f), lambda i: (i, 0)),
        compiler_params=pltpu.CompilerParams(dimension_semantics=("parallel",)),
    )(h, x_skip, w, b, beta)
    return out[:n] if n_pad != n else out


# ---------------------------------------------------------------------------
# Weight-only precompute (done ONCE, outside the forward pass)
# ---------------------------------------------------------------------------
def _block_diag(rel):
    """rel: [H, D, D] -> block-diagonal [H*D, H*D]."""
    h, d, _ = rel.shape
    eye = jnp.eye(h, dtype=rel.dtype)
    return jnp.einsum("hab,hg->hagb", rel, eye).reshape(h * d, h * d)


def _fold_rel(lin, rel):
    """(x @ W + b) per-head @ rel[h]  ==  x @ (W @ R) + (b @ R), R = blockdiag(rel)."""
    r = _block_diag(rel)
    return lin["w"] @ r, lin["b"] @ r


def _head_sum_matrix(p_rel, heads, d, scale):
    """S[h*D + dd, h'] = scale * p_rel[h] * (h == h')."""
    s = (p_rel.reshape(heads, 1) * scale) * jnp.eye(heads, dtype=jnp.float32)
    return jnp.repeat(s, d, axis=0)  # [H*D, H]


def prepare_hgt_params(params, node_types, edge_types, heads):
    """Fold a_rel/m_rel into K/V weights, fuse Q+K+V per node type into one wide
    lane-dense weight, bake p_rel/scale into the head-sum selector, fold the skip
    alpha into a_lin, pre-cast weights to bf16, pad the classifier to 128 lanes."""
    hidden = params["lin_dict"][node_types[0]]["w"].shape[1]
    d = hidden // heads
    scale = 1.0 / math.sqrt(d)

    prep = {"hidden": hidden, "heads": heads}
    prep["lin_dict"] = {
        nt: {"w": params["lin_dict"][nt]["w"].astype(jnp.bfloat16),
             "b": params["lin_dict"][nt]["b"].astype(jnp.float32)}
        for nt in node_types}

    prep["convs"] = []
    for conv in params["convs"]:
        c = {"proj": {}, "edge_cols": {}, "head_sum_T": {}, "a_lin": {}, "beta": {}}
        for nt in node_types:
            # Fused projection: [Q | (K,V) for every edge type with src == nt],
            # padded to a multiple of 128 lanes.
            cols_w = [conv["q_lin"][nt]["w"]]
            cols_b = [conv["q_lin"][nt]["b"]]
            col_map = {}
            offset = hidden
            for et in edge_types:
                if et[0] != nt:
                    continue
                ekey = "__".join(et)
                wk, bk = _fold_rel(conv["k_lin"][nt], conv["a_rel"][ekey])
                wv, bv = _fold_rel(conv["v_lin"][nt], conv["m_rel"][ekey])
                cols_w += [wk, wv]
                cols_b += [bk, bv]
                col_map[ekey] = (offset, offset + hidden)  # (K start, V start)
                offset += 2 * hidden
            w_f = jnp.concatenate(cols_w, axis=1)
            b_f = jnp.concatenate(cols_b, axis=1)
            m = w_f.shape[1]
            m_pad = _round_up(max(m, 128), 128)
            if m_pad != m:
                w_f = jnp.pad(w_f, ((0, 0), (0, m_pad - m)))
                b_f = jnp.pad(b_f, ((0, 0), (0, m_pad - m)))
            c["proj"][nt] = {"w": w_f.astype(jnp.bfloat16),
                             "b": b_f.astype(jnp.float32)}
            c["edge_cols"][nt] = col_map

            # Skip-gated output projection: fold alpha into W/b, keep beta vector.
            alpha = jax.nn.sigmoid(conv["skip"][nt])
            c["a_lin"][nt] = {"w": (alpha * conv["a_lin"][nt]["w"]).astype(jnp.bfloat16),
                              "b": (alpha * conv["a_lin"][nt]["b"]).astype(jnp.float32)}
            c["beta"][nt] = jnp.full((1, hidden), 1.0, jnp.float32) - alpha

        for et in edge_types:
            ekey = "__".join(et)
            s = _head_sum_matrix(conv["p_rel"][ekey], heads, d, scale)   # [hidden, H]
            c["head_sum_T"][ekey] = jnp.transpose(s).astype(jnp.float32)  # [H, hidden]
        prep["convs"].append(c)

    # Final classifier: pad out_ch up to a full 128-lane slab (unmasked stores).
    w, b = params["lin"]["w"], params["lin"]["b"]
    out_ch = w.shape[1]
    f_pad = _round_up(out_ch, 128)
    if f_pad != out_ch:
        w = jnp.pad(w, ((0, 0), (0, f_pad - out_ch)))
        b = jnp.pad(b, ((0, 0), (0, f_pad - out_ch)))
    prep["lin"] = {"w": w.astype(jnp.bfloat16), "b": b.astype(jnp.float32)}
    prep["out_ch"] = out_ch
    return prep


# ---------------------------------------------------------------------------
# Plain-JAX glue (data-dependent gather / segment softmax / scatter-add)
# ---------------------------------------------------------------------------
def segment_softmax(scores, seg_ids, num_segments):
    # PyG torch_geometric.utils.softmax semantics (per-destination, per-head).
    seg_max = jax.ops.segment_max(scores, seg_ids, num_segments=num_segments)
    ex = jnp.exp(scores - seg_max[seg_ids])
    denom = jax.ops.segment_sum(ex, seg_ids, num_segments=num_segments)
    return ex / (denom[seg_ids] + 1e-16)


def hgt_conv_forward(cp, x_dict, edge_index_dict, heads, hidden):
    d = hidden // heads

    # One fused wide matmul per node type: reads x once, emits Q + all folded
    # K/V columns for every edge type with this source type (lane-dense M_pad).
    proj = {}
    for nt, x in x_dict.items():
        proj[nt] = None if x is None else linear_pallas(x, cp["proj"][nt]["w"],
                                                        cp["proj"][nt]["b"])
    q_dict = {nt: (None if proj[nt] is None else proj[nt][:, :hidden]) for nt in x_dict}

    out_dict = {nt: [] for nt in x_dict}
    for edge_type, edge_index in edge_index_dict.items():
        src_t, _, dst_t = edge_type
        ekey = "__".join(edge_type)
        if proj.get(src_t) is None or q_dict.get(dst_t) is None:
            continue
        k_start, v_start = cp["edge_cols"][src_t][ekey]
        k_rel = proj[src_t][:, k_start:k_start + hidden]
        v_rel = proj[src_t][:, v_start:v_start + hidden]

        src, dst = edge_index[0], edge_index[1]
        # TODO(synk): at production edge counts fuse these data-dependent row
        # gathers (and the downstream scatter-add) into the score kernel via
        # PrefetchScalarGridSpec + manual DMA gather from pl.ANY node tables.
        k_j = jnp.take(k_rel, src, axis=0)                 # [E, hidden] bf16
        v_j = jnp.take(v_rel, src, axis=0)                 # [E, hidden] bf16
        q_i = jnp.take(q_dict[dst_t], dst, axis=0)         # [E, hidden] bf16

        scores_t = edge_score_pallas(q_i, k_j, cp["head_sum_T"][ekey])   # [H, E]
        scores = scores_t.T                                 # single tiny XLA transpose
        num_dst = q_dict[dst_t].shape[0]
        alpha = segment_softmax(scores, dst, num_dst)       # [E, H] f32
        # XLA fuses the alpha * v multiply into the scatter-add.
        msg = v_j.astype(jnp.float32) * jnp.repeat(alpha, d, axis=1)     # [E, hidden]
        agg = jax.ops.segment_sum(msg, dst, num_segments=num_dst)
        out_dict[dst_t].append(agg)

    new_x = {}
    for nt, outs in out_dict.items():
        if not outs:
            new_x[nt] = None   # matches PyG group() returning None for edge-less dst
            continue
        grouped = outs[0]
        for o in outs[1:]:
            grouped = grouped + o                           # group='sum'
        # TODO(synk): exact erf GELU kept in XLA glue; it fuses with the scatter.
        g = jax.nn.gelu(grouped, approximate=False)
        al = cp["a_lin"][nt]
        new_x[nt] = a_lin_skip_pallas(g, al["w"], al["b"], x_dict[nt], cp["beta"][nt])
    return new_x


def hgt_forward(prep, x_dict, edge_index_dict):
    hidden, heads = prep["hidden"], prep["heads"]
    h = {nt: linear_pallas(x, prep["lin_dict"][nt]["w"], prep["lin_dict"][nt]["b"],
                           activation="relu")
         for nt, x in x_dict.items()}
    for cp in prep["convs"]:
        h = hgt_conv_forward(cp, h, edge_index_dict, heads, hidden)

    y = linear_pallas(h["paper"], prep["lin"]["w"], prep["lin"]["b"],
                      out_dtype=jnp.float32)
    out_ch = prep["out_ch"]
    return y[:, :out_ch] if y.shape[1] != out_ch else y


# ---------------------------------------------------------------------------
# Deterministic parameter initialization (shapes follow HGT.__init__)
# ---------------------------------------------------------------------------
def _linear_init(key, fin, fout):
    kw, kb = jax.random.split(key)
    lim = 1.0 / math.sqrt(fin)
    return {"w": jax.random.uniform(kw, (fin, fout), jnp.float32, -lim, lim),
            "b": jax.random.uniform(kb, (1, fout), jnp.float32, -lim, lim)}


def _glorot(key, shape):
    lim = math.sqrt(6.0 / (shape[-2] + shape[-1]))
    return jax.random.uniform(key, shape, jnp.float32, -lim, lim)


def init_hgt_params(key, node_types, edge_types, in_dims, hidden, out_ch, heads, num_layers):
    d = hidden // heads
    keys = iter(jax.random.split(key, 256))
    params = {"lin_dict": {nt: _linear_init(next(keys), in_dims[nt], hidden)
                           for nt in node_types}}
    convs = []
    for _ in range(num_layers):
        conv = {name: {nt: _linear_init(next(keys), hidden, hidden) for nt in node_types}
                for name in ("k_lin", "q_lin", "v_lin", "a_lin")}
        conv["skip"] = {nt: jnp.float32(1.0) for nt in node_types}
        conv["a_rel"] = {"__".join(et): _glorot(next(keys), (heads, d, d)) for et in edge_types}
        conv["m_rel"] = {"__".join(et): _glorot(next(keys), (heads, d, d)) for et in edge_types}
        conv["p_rel"] = {"__".join(et): jnp.ones((1, heads), jnp.float32) for et in edge_types}
        convs.append(conv)
    params["convs"] = convs
    params["lin"] = _linear_init(next(keys), hidden, out_ch)
    return params


# ---------------------------------------------------------------------------
if __name__ == "__main__":
    hidden, out_ch, heads, num_layers = 32, 8, 4, 2
    node_types = ["paper", "author"]
    edge_types = [("author", "writes", "paper"),
                  ("paper", "rev_writes", "author"),
                  ("paper", "cites", "paper")]
    num_nodes = {"paper": 24, "author": 16}
    in_dims = {"paper": 16, "author": 12}

    root = jax.random.PRNGKey(0)
    k_feat, k_edge, k_par = jax.random.split(root, 3)

    fk = jax.random.split(k_feat, len(node_types))
    x_dict = {nt: jax.random.normal(fk[i], (num_nodes[nt], in_dims[nt]), jnp.float32)
              for i, nt in enumerate(node_types)}

    ek = jax.random.split(k_edge, 4)
    w_src = jax.random.randint(ek[0], (40,), 0, num_nodes["author"], jnp.int32)
    w_dst = jax.random.randint(ek[1], (40,), 0, num_nodes["paper"], jnp.int32)
    c_src = jax.random.randint(ek[2], (32,), 0, num_nodes["paper"], jnp.int32)
    c_dst = jax.random.randint(ek[3], (32,), 0, num_nodes["paper"], jnp.int32)
    edge_index_dict = {
        ("author", "writes", "paper"): jnp.stack([w_src, w_dst]),
        ("paper", "rev_writes", "author"): jnp.stack([w_dst, w_src]),
        ("paper", "cites", "paper"): jnp.stack([c_src, c_dst]),
    }

    params = init_hgt_params(k_par, node_types, edge_types, in_dims,
                             hidden, out_ch, heads, num_layers)
    # Weight-only precompute happens exactly once, outside the forward pass.
    prep = prepare_hgt_params(params, node_types, edge_types, heads)

    out = hgt_forward(prep, x_dict, edge_index_dict)
    out = jax.block_until_ready(out)
    assert out.shape == (num_nodes["paper"], out_ch)
    assert bool(jnp.all(jnp.isfinite(out)))
    print("KERNEL_OK")
</pallas_src>

<mosaic_0001>
module attributes {stable_mosaic.version = 11 : i64} {
  func.func @_linear_kernel(%arg0: i32, %arg1: memref<32x16xf32, #tpu.memory_space<vmem>>, %arg2: memref<16x32xbf16, #tpu.memory_space<vmem>>, %arg3: memref<1x32xf32, #tpu.memory_space<vmem>>, %arg4: memref<32x32xbf16, #tpu.memory_space<vmem>>) attributes {dimension_semantics = [#tpu.dimension_semantics<parallel>], iteration_bounds = array<i64: 1>, scalar_prefetch = 0 : i64, scratch_operands = 0 : i64, tpu.core_type = #tpu.core_type<tc>, window_params = [{transform_indices = @transform_0, window_bounds = array<i64: 32, 16>}, {pipeline_mode = #tpu.pipeline_mode<synchronous>, transform_indices = @transform_1, window_bounds = array<i64: 16, 32>}, {pipeline_mode = #tpu.pipeline_mode<synchronous>, transform_indices = @transform_2, window_bounds = array<i64: 1, 32>}, {transform_indices = @transform_3, window_bounds = array<i64: 32, 32>}]} {
    %c0 = arith.constant 0 : index
    %c0_0 = arith.constant 0 : index
    %0 = vector.load %arg1[%c0, %c0_0] : memref<32x16xf32, #tpu.memory_space<vmem>>, vector<32x16xf32>
    %1 = arith.truncf %0 : vector<32x16xf32> to vector<32x16xbf16>
    %c0_1 = arith.constant 0 : index
    %c0_2 = arith.constant 0 : index
    %2 = vector.load %arg2[%c0_1, %c0_2] : memref<16x32xbf16, #tpu.memory_space<vmem>>, vector<16x32xbf16>
    %cst = arith.constant dense<0.000000e+00> : vector<32x32xf32>
    %3 = tpu.matmul %1, %2, %cst {dimension_numbers = #tpu.dot_dimension_numbers<[1], [0], [0], [1], [0, 0, 1, 1], [], []>} : vector<32x16xbf16>, vector<16x32xbf16>, vector<32x32xf32> -> vector<32x32xf32>
    %c0_3 = arith.constant 0 : index
    %c0_4 = arith.constant 0 : index
    %4 = vector.load %arg3[%c0_3, %c0_4] : memref<1x32xf32, #tpu.memory_space<vmem>>, vector<1x32xf32>
    %5 = vector.broadcast %4 : vector<1x32xf32> to vector<32x32xf32>
    %6 = arith.addf %3, %5 : vector<32x32xf32>
    %cst_5 = arith.constant 0.000000e+00 : f32
    %7 = vector.broadcast %cst_5 : f32 to vector<32x32xf32>
    %8 = arith.maximumf %6, %7 : vector<32x32xf32>
    %9 = arith.truncf %8 : vector<32x32xf32> to vector<32x32xbf16>
    %c0_6 = arith.constant 0 : index
    %c0_7 = arith.constant 0 : index
    %10 = vector.load %arg4[%c0_6, %c0_7] : memref<32x32xbf16, #tpu.memory_space<vmem>>, vector<32x32xbf16>
    tpu.vector_store %arg4[%c0_6, %c0_7], %9 {strides = array<i32>} : memref<32x32xbf16, #tpu.memory_space<vmem>>, vector<32x32xbf16>,
    return
  }
  func.func @transform_0(%arg0: i32) -> (i32, i32) {
    %c0_i32 = arith.constant 0 : i32
    %c0_i32_0 = arith.constant 0 : i32
    return %arg0, %c0_i32 : i32, i32
  }
  func.func @transform_1(%arg0: i32) -> (i32, i32) {
    %c0_i32 = arith.constant 0 : i32
    %c0_i32_0 = arith.constant 0 : i32
    %c0_i32_1 = arith.constant 0 : i32
    return %c0_i32, %c0_i32_0 : i32, i32
  }
  func.func @transform_2(%arg0: i32) -> (i32, i32) {
    %c0_i32 = arith.constant 0 : i32
    %c0_i32_0 = arith.constant 0 : i32
    %c0_i32_1 = arith.constant 0 : i32
    return %c0_i32, %c0_i32_0 : i32, i32
  }
  func.func @transform_3(%arg0: i32) -> (i32, i32) {
    %c0_i32 = arith.constant 0 : i32
    %c0_i32_0 = arith.constant 0 : i32
    return %arg0, %c0_i32 : i32, i32
  }
}

</mosaic_0001>

<bundles_post_ra>
// kernel: tpu_custom_call.1
= control target key start
LH: loop header
LB: loop body
LE: loop exit
PB: predicated region body
PF: predicated region fallthrough
CT: control target
= control target key end

     0   :  { %vm37_vm0 = vcmask 130048   ;;  %s229_s0 = inlined_call_operand.vmem [shape: f32[32,16], index: 0, kind: input, shape index: {}]   ;;  %s230_s1 = inlined_call_operand.vmem [shape: bf16[16,32], index: 1, kind: input, shape index: {}]   ;;  %s231_s2 = inlined_call_operand.vmem [shape: f32[1,32], index: 2, kind: input, shape index: {}]   ;;  %s232_s3 = inlined_call_operand.hbm [shape: bf16[32,32], index: 3, kind: output, shape index: {}]  }
   0x1   :  { %v158_v0 = vld [vmem:[%s230_s1] sm:$0xff]   ;;  %v17_v2 = vld [vmem:[%s229_s0 + $0x8] sm:$0xff]  ;;  %v18_v3 = vld [vmem:[%s229_s0 + $0x10] sm:$0xff] }
   0x2   :  { %v16_v1 = vld [vmem:[%s229_s0] sm:$0xff]  ;;  %149 = vmatprep.subr.bf16.mxu0 %v158_v0  ;;  %v19_v5 = vld [vmem:[%s229_s0 + $0x18] sm:$0xff] }
   0x3   :  { %v20_v4 = vpack.c.bf16 %v17_v2, %v16_v1 }
   0x4   :  { %8 = vsyncpa [#allocation3], 0  ;;  %150 = vmatpush3.bf16.msra.mxu0 %v158_v0  ;;  %v21_v6 = vpack.c.bf16 %v19_v5, %v18_v3  ;;  %v134_v7 = vld [vmem:[%s231_s2] ss:$0 sm:$0xff]  ;;  %vm113_vm1 = vcmask 257024   ;;  %s181_s0 = smov [#allocation2]  }
   0x5   :  { %151 = vmatprep.mubr.msk.bf16.mxu0 %vm37_vm0, %v20_v4  ;;  %s123_s23 = sshll.u32 %s181_s0, 4  ;;  %s124_s23 = int_to_ptr.vmem [resolvable:$true] %s123_s23 }
   0x6   :  { %s159_s2 = scalar_lea.vmem %s124_s23, 256  ;;  %p164_p1 = scmp.lt.s32.totalorder %s124_s23, %s124_s23 }
   0x7   :  { %152 = vmatmul.mubr.msk.bf16.vlgmr.msra.gmra.mxu0 %vm37_vm0, %v21_v6  ;;  %p160_p0 = scmp.ne.s32.totalorder %s124_s23, %s159_s2  ;;  %p165_p2 = scmp.lt.s32.totalorder %s159_s2, %s159_s2 }
   0x9   :  { %p166_p3 = por %p165_p2, %p164_p1 }
   0xb   :  { %p167_p4 = pnand %p166_p3, %p160_p0 }
  0xc7   :  { %v153_v8 = vpop.f32.mrf.mxu0 }
  0xc8   :  { %v87_v9 = vadd.f32 %v153_v8, %v134_v7 }
  0xc9   :  { %v78_v10 = vpop.f32.mrf.mxu0 }
  0xca   :  { %v95_v11 = vmax.f32 %v87_v9, 0.0  ;;  %v79_v12 = vadd.f32 %v134_v7, %v78_v10 }
  0xcb   :  { %v154_v13 = vpop.f32.mrf.mxu0 }
  0xcc   :  { %v144_v14 = vpack.c.bf16 %v95_v11, %v95_v11  ;;  %v93_v15 = vmax.f32 %v79_v12, 0.0  ;;  %v90_v16 = vadd.f32 %v154_v13, %v134_v7 }
  0xcd   :  { %v81_v17 = vpop.f32.mrf.mxu0 }
  0xce   :  { %116 = vst.msk [vmem:[#allocation2 + $0x8] sm:$0xf] %vm113_vm1, %v144_v14  ;;  %v142_v18 = vpack.c.bf16 %v93_v15, %v93_v15  ;;  %v96_v19 = vmax.f32 %v90_v16, 0.0  ;;  %v82_v20 = vadd.f32 %v134_v7, %v81_v17 }
  0xd0   :  { %114 = vst.msk [vmem:[#allocation2] sm:$0xf] %vm113_vm1, %v142_v18  ;;  %v145_v21 = vpack.c.bf16 %v96_v19, %v96_v19  ;;  %v94_v22 = vmax.f32 %v82_v20, 0.0 }
  0xd2   :  { %117 = vst.msk [vmem:[#allocation2 + $0xc] sm:$0xf] %vm113_vm1, %v145_v21  ;;  %v143_v23 = vpack.c.bf16 %v94_v22, %v94_v22 }
  0xd4   :  { %115 = vst.msk [vmem:[#allocation2 + $0x4] sm:$0xf] %vm113_vm1, %v143_v23 }
  0xd5   :  { %170 = shalt.err (!%p167_p4)
}
  0xd6   :  { %s182_s24 = smov 64   ;;  %s183_s25 = smov 4  }
  0xd7   :  { %129 = dma.vmem_to_hbm [thread:$0]  %s124_s23, 256, %s232_s3, [#allocation3], %s182_s24, %s182_s24, %s183_s25  }
  0xd8   :  { %179 = dma.done.wait [#allocation3], 256  }
  0xd9   :  { %180 = vsyncadd [#allocation3], 4294967040 }
  0xda   :  { %133 = vsyncpa [#allocation3], 1 }

</bundles_post_ra>
